<compile_context>
chip_gen: v5e
topology: v5e:2x2
jax: 0.10.0
libtpu: 0.0.40
codegen_flags: <defaults>
</compile_context>

<pallas_src>
import jax
import jax.numpy as jnp
from jax.experimental import pallas as pl
from jax.experimental.pallas import tpu as pltpu


def _round_up(x, m):
    return ((x + m - 1) // m) * m


# ----------------------------------------------------------------------------
# One-time table preparation (hoisted out of the per-call path per review).
# ----------------------------------------------------------------------------
def build_user_embedding_tables(w_gender, w_age, w_occupation, w_area):
    """Build the block-diagonal combined table once; reuse across forward calls.

    Returns:
      w_cat   : (n_pad, 4*D) float32, table c occupies rows [off_c, off_c+size_c)
                and column slab [c*D, (c+1)*D).
      offsets : (4,) int32 row offsets to pre-add to the per-column indices.
    """
    tables = (w_gender, w_age, w_occupation, w_area)
    D = int(w_gender.shape[1])
    sizes = [int(t.shape[0]) for t in tables]
    offsets, acc = [], 0
    for s in sizes:
        offsets.append(acc)
        acc += s
    n_pad = _round_up(acc, 128)  # lane-aligned K for the MXU feed

    w_cat = jnp.zeros((n_pad, 4 * D), jnp.float32)
    for c, t in enumerate(tables):
        w_cat = w_cat.at[offsets[c]:offsets[c] + sizes[c], c * D:(c + 1) * D].set(
            t.astype(jnp.float32)
        )
    return w_cat, jnp.asarray(offsets, jnp.int32)


# ----------------------------------------------------------------------------
# Kernel
# ----------------------------------------------------------------------------
def _user_embedding_kernel(idx_ref, w_ref, out_ref):
    # idx_ref : (TB, 4)        int32   (offsets already added in the wrapper)
    # w_ref   : (n_pad, 4*D)   float32 (VMEM-resident: constant index_map)
    # out_ref : (TB, 4*D)      float32 (lane-dense, unmasked full-width store)
    idx = idx_ref[...]
    tb = idx.shape[0]
    n_pad = w_ref.shape[0]

    iota = jax.lax.broadcasted_iota(jnp.int32, (tb, n_pad), 1)

    # Multi-hot LHS: 4 compares OR'd as a balanced tree, one cast (review item).
    m0 = iota == idx[:, 0:1]
    m1 = iota == idx[:, 1:2]
    m2 = iota == idx[:, 2:3]
    m3 = iota == idx[:, 3:4]
    onehot = ((m0 | m1) | (m2 | m3)).astype(w_ref.dtype)

    # One MXU matmul -> already-concatenated (TB, 4*D) result.
    out_ref[...] = jnp.dot(
        onehot, w_ref[...], preferred_element_type=jnp.float32
    ).astype(out_ref.dtype)


# ----------------------------------------------------------------------------
# Tile / VMEM sizing (sized against v7x's 64 MiB; generous on v5e/v6e).
# ----------------------------------------------------------------------------
_VMEM_BUDGET_BYTES = 40 * 1024 * 1024


def _pick_batch_tile(B, n_pad, dcat, tb_request):
    if B < 8:
        tb = B  # full-extent block: exempt from the sublane-alignment rule
    else:
        tb_max = (B // 8) * 8                     # multiple of 8, never exceeds B
        tb = max(8, min(_round_up(tb_request, 8), tb_max))

    def est(t):
        return (2 * t * dcat * 4      # double-buffered output tiles
                + 2 * t * 128 * 4     # double-buffered (lane-padded) index tiles
                + t * n_pad * 4       # (TB, n_pad) f32 one-hot intermediate
                + t * dcat * 4        # f32 matmul result
                + 2 * n_pad * dcat * 4)  # resident combined table (default 2 buffers)

    while B >= 8 and tb > 8 and est(tb) > _VMEM_BUDGET_BYTES:
        tb = max(8, (tb // 2 // 8) * 8)

    vmem_limit = int(min(max(est(tb) * 3 // 2, 16 << 20), 60 << 20))
    return tb, vmem_limit


# ----------------------------------------------------------------------------
# Forward
# ----------------------------------------------------------------------------
def user_embedding_ml(user_fea, w_cat, offsets, *, tb=8192):
    """Pallas equivalent of UserEmbeddingML.forward.

    user_fea : (B, 4) int32
    w_cat    : (n_pad, 4*D) float32 from build_user_embedding_tables (built once)
    offsets  : (4,) int32 from build_user_embedding_tables
    returns  : (B, 4*D) float32
    """
    B = user_fea.shape[0]
    n_pad, dcat = int(w_cat.shape[0]), int(w_cat.shape[1])
    TB, vmem_limit = _pick_batch_tile(B, n_pad, dcat, int(tb))

    # Pre-add band offsets in the wrapper (review item): kernel compares directly.
    idx = user_fea.astype(jnp.int32) + offsets[None, :]

    grid = (pl.cdiv(B, TB),)  # ragged last block handled by masked boundary writeback

    return pl.pallas_call(
        _user_embedding_kernel,
        out_shape=jax.ShapeDtypeStruct((B, dcat), jnp.float32),
        grid_spec=pltpu.PrefetchScalarGridSpec(
            num_scalar_prefetch=0,
            grid=grid,
            in_specs=[
                pl.BlockSpec((TB, 4), lambda i: (i, 0)),          # index tile (pipelined)
                pl.BlockSpec((n_pad, dcat), lambda i: (0, 0)),    # resident combined table
            ],
            out_specs=pl.BlockSpec((TB, dcat), lambda i: (i, 0)), # lane-dense output tile
        ),
        compiler_params=pltpu.CompilerParams(
            dimension_semantics=("parallel",),
            vmem_limit_bytes=vmem_limit,
        ),
        cost_estimate=pl.CostEstimate(
            flops=2 * B * n_pad * dcat,
            transcendentals=0,
            bytes_accessed=B * 4 * 4 + B * dcat * 4 + n_pad * dcat * 4,
        ),
    )(idx, w_cat)


if __name__ == "__main__":
    # Small config consistent with the module (MovieLens-like, shrunk).
    num_gender = 2
    num_age = 7
    num_occupation = 21
    num_zipcode = 16
    embedding_dim = 32
    batch = 10  # deliberately not a multiple of 8: exercises the ragged-last-block path

    key = jax.random.PRNGKey(0)
    k_g, k_a, k_o, k_z, k_i = jax.random.split(key, 5)

    # torch.nn.Embedding default init ~ N(0, 1); deterministic synthetic weights.
    w_gender = jax.random.normal(k_g, (num_gender, embedding_dim), jnp.float32)
    w_age = jax.random.normal(k_a, (num_age, embedding_dim), jnp.float32)
    w_occupation = jax.random.normal(k_o, (num_occupation, embedding_dim), jnp.float32)
    w_area = jax.random.normal(k_z, (num_zipcode, embedding_dim), jnp.float32)

    # user_fea: (B, 4) int32 with valid per-column indices.
    ki0, ki1, ki2, ki3 = jax.random.split(k_i, 4)
    user_fea = jnp.stack(
        [
            jax.random.randint(ki0, (batch,), 0, num_gender, jnp.int32),
            jax.random.randint(ki1, (batch,), 0, num_age, jnp.int32),
            jax.random.randint(ki2, (batch,), 0, num_occupation, jnp.int32),
            jax.random.randint(ki3, (batch,), 0, num_zipcode, jnp.int32),
        ],
        axis=1,
    )

    # Build the combined table ONCE (hoisted out of the per-call path).
    w_cat, offsets = build_user_embedding_tables(w_gender, w_age, w_occupation, w_area)

    fwd = jax.jit(user_embedding_ml)
    out = jax.block_until_ready(fwd(user_fea, w_cat, offsets))

    # Reference check (plain JAX gather + concat), mirrors the PyTorch forward.
    ref = jnp.concatenate(
        [
            w_gender[user_fea[:, 0]],
            w_age[user_fea[:, 1]],
            w_occupation[user_fea[:, 2]],
            w_area[user_fea[:, 3]],
        ],
        axis=1,
    )
    assert out.shape == (batch, 4 * embedding_dim)
    assert jnp.allclose(out, ref, atol=1e-6), "mismatch vs reference"

    print("KERNEL_OK")
</pallas_src>

<mosaic_0001>
module attributes {stable_mosaic.version = 11 : i64} {
  func.func @_user_embedding_kernel(%arg0: i32, %arg1: memref<8x4xi32, #tpu.memory_space<vmem>>, %arg2: memref<128x128xf32, #tpu.memory_space<vmem>>, %arg3: memref<8x128xf32, #tpu.memory_space<vmem>>) attributes {dimension_semantics = [#tpu.dimension_semantics<parallel>], iteration_bounds = array<i64: 2>, scalar_prefetch = 0 : i64, scratch_operands = 0 : i64, tpu.core_type = #tpu.core_type<tc>, window_params = [{transform_indices = @transform_0, window_bounds = array<i64: 8, 4>}, {pipeline_mode = #tpu.pipeline_mode<synchronous>, transform_indices = @transform_1, window_bounds = array<i64: 128, 128>}, {transform_indices = @transform_2, window_bounds = array<i64: 8, 128>}]} {
    %c0 = arith.constant 0 : index
    %c0_0 = arith.constant 0 : index
    %0 = vector.load %arg1[%c0, %c0_0] : memref<8x4xi32, #tpu.memory_space<vmem>>, vector<8x4xi32>
    %1 = tpu.iota {dimensions = array<i32: 1>} : vector<8x128xi32>
    %2 = vector.extract_strided_slice %0 {offsets = [0, 0], sizes = [8, 1], strides = [1, 1]} : vector<8x4xi32> to vector<8x1xi32>
    %3 = vector.broadcast %2 : vector<8x1xi32> to vector<8x128xi32>
    %4 = arith.cmpi eq, %1, %3 : vector<8x128xi32>
    %5 = vector.extract_strided_slice %0 {offsets = [0, 1], sizes = [8, 1], strides = [1, 1]} : vector<8x4xi32> to vector<8x1xi32>
    %6 = vector.broadcast %5 : vector<8x1xi32> to vector<8x128xi32>
    %7 = arith.cmpi eq, %1, %6 : vector<8x128xi32>
    %8 = vector.extract_strided_slice %0 {offsets = [0, 2], sizes = [8, 1], strides = [1, 1]} : vector<8x4xi32> to vector<8x1xi32>
    %9 = vector.broadcast %8 : vector<8x1xi32> to vector<8x128xi32>
    %10 = arith.cmpi eq, %1, %9 : vector<8x128xi32>
    %11 = vector.extract_strided_slice %0 {offsets = [0, 3], sizes = [8, 1], strides = [1, 1]} : vector<8x4xi32> to vector<8x1xi32>
    %12 = vector.broadcast %11 : vector<8x1xi32> to vector<8x128xi32>
    %13 = arith.cmpi eq, %1, %12 : vector<8x128xi32>
    %14 = arith.ori %4, %7 : vector<8x128xi1>
    %15 = arith.ori %10, %13 : vector<8x128xi1>
    %16 = arith.ori %14, %15 : vector<8x128xi1>
    %17 = arith.extui %16 : vector<8x128xi1> to vector<8x128xi32>
    %18 = arith.sitofp %17 : vector<8x128xi32> to vector<8x128xf32>
    %c0_1 = arith.constant 0 : index
    %c0_2 = arith.constant 0 : index
    %19 = vector.load %arg2[%c0_1, %c0_2] : memref<128x128xf32, #tpu.memory_space<vmem>>, vector<128x128xf32>
    %cst = arith.constant dense<0.000000e+00> : vector<8x128xf32>
    %20 = tpu.matmul %18, %19, %cst {dimension_numbers = #tpu.dot_dimension_numbers<[1], [0], [0], [1], [0, 0, 1, 1], [], []>} : vector<8x128xf32>, vector<128x128xf32>, vector<8x128xf32> -> vector<8x128xf32>
    %c0_3 = arith.constant 0 : index
    %c0_4 = arith.constant 0 : index
    %21 = vector.load %arg3[%c0_3, %c0_4] : memref<8x128xf32, #tpu.memory_space<vmem>>, vector<8x128xf32>
    tpu.vector_store %arg3[%c0_3, %c0_4], %20 {strides = array<i32>} : memref<8x128xf32, #tpu.memory_space<vmem>>, vector<8x128xf32>,
    return
  }
  func.func @transform_0(%arg0: i32) -> (i32, i32) {
    %c0_i32 = arith.constant 0 : i32
    %c0_i32_0 = arith.constant 0 : i32
    return %arg0, %c0_i32 : i32, i32
  }
  func.func @transform_1(%arg0: i32) -> (i32, i32) {
    %c0_i32 = arith.constant 0 : i32
    %c0_i32_0 = arith.constant 0 : i32
    %c0_i32_1 = arith.constant 0 : i32
    return %c0_i32, %c0_i32_0 : i32, i32
  }
  func.func @transform_2(%arg0: i32) -> (i32, i32) {
    %c0_i32 = arith.constant 0 : i32
    %c0_i32_0 = arith.constant 0 : i32
    return %arg0, %c0_i32 : i32, i32
  }
}

</mosaic_0001>

<bundles_post_ra>
// kernel: user_embedding_ml.1
= control target key start
LH: loop header
LB: loop body
LE: loop exit
PB: predicated region body
PF: predicated region fallthrough
CT: control target
= control target key end

     0   :  { %7 = vsyncpa [#allocation3], 0  ;;  %s596_s0 = inlined_call_operand.vmem [shape: s32[10,4], index: 0, kind: input, shape index: {}]   ;;  %s597_s1 = inlined_call_operand.hbm [shape: f32[128,128], index: 1, kind: input, shape index: {}]   ;;  %s598_s2 = inlined_call_operand.hbm [shape: f32[10,128], index: 2, kind: output, shape index: {}]  }
   0x1   :  { %8 = vsyncpa [#allocation4], 0 }
   0x2   :  { %10 = vsyncpa [#allocation4 + $0x1], 0  ;;  %s501_s9 = smov 0   ;;  %s503_s10 = smov 0  }
   0x3   :  { %s505_s11 = smov 0   ;;  %s507_s12 = smov 0  }
   0x4 LB: > { %s522_s13 = sadd.s32 4294967295, %s476_s12   ;;  %s304_s14 = sadd.s32 4294967294, %s476_s12   ;;  %s476_s12 = sphi %s507_s12, %s604_s12   ;;  %s472_s11 = sphi %s505_s11, %s603_s11   ;;  %s468_s10 = sphi %s503_s10, %s602_s10   ;;  %s464_s9 = sphi %s501_s9, %s601_s9  }
   0x5   : > { %s526_s15 = sadd.s32 1, %s476_s12   ;;  %s70_s16 = sadd.s32 1, %s472_s11 }
   0x6   : > { %s67_s17 = ssub.s32 %s476_s12, %s526_s15  ;;  %p80_p0 = scmp.ne.s32.totalorder %s472_s11, %s468_s10 }
   0x7   : > { %p68_p1 = scmp.eq.s32.totalorder %s67_s17, 0  ;;  %p81_p2 = scmp.eq.s32.totalorder %s522_s13, 1 }
   0x8   : > { %p86_p3 = scmp.ne.s32.totalorder %s468_s10, %s464_s9  ;;  %p87_p4 = scmp.eq.s32.totalorder %s304_s14, 1 }
   0x9   : > { %s537_s18 = scalar_select %p68_p1, %s472_s11, %s70_s16  }
   0xa   : > { %p539_p5 = por %p81_p2, %p80_p0  ;;  %p543_p6 = por %p87_p4, %p86_p3 }
   0xb   : > { %p305_p7 = scmp.ge.s32.totalorder %s476_s12, 1  ;;  %p94_p8 = scmp.lt.s32.totalorder %s476_s12, 3 }
   0xc   : > { %p332_p9 = scmp.eq.s32.totalorder %s522_s13, 0  ;;  %s105_s23 = sshll.u32 %s597_s1, 4  ;;  %s106_s23 = int_to_ptr.hbm [resolvable:$true] %s105_s23 }
   0xd   : > { %p95_p10 = pnand %p305_p7, %p94_p8  ;;  %s478_s24 = smov [#allocation2]  }
   0xe   : > { %s107_s25 = sshll.u32 %s478_s24, 4  ;;  %s479_s26 = smov 128   ;;  %s108_s25 = int_to_ptr.vmem [resolvable:$true] %s107_s25 }
   0xf   : > { %p324_p11 = pneg %p95_p10  ;;  %s480_s27 = smov 8  }
  0x10   : > { %130 = sbr.rel (%p95_p10) target bundleno = 286 (0x11e), region = 28 }
  0x11   : > { %p325_p12 = pnand %p332_p9, %p324_p11 }
  0x13   : > { %327 = dma.hbm_to_vmem [thread:$0]  (!%p325_p12), %s106_s23, 2048, %s108_s25, [#allocation3], %s479_s26, %s479_s26, %s480_s27  }
  0x15   : > { %455 = dma.done.wait (%p332_p9), [#allocation3], 2048  }
  0x16   : > { %457 = vsyncadd (%p332_p9), [#allocation3], 4294965248  ;;  %p152_p13 = scmp.lt.s32.totalorder %s522_s13, 1  ;;  %v481_v0 = vmov 2   ;;  %v482_v1 = vmov 0   ;;  %v195_v3 = vld [vmem:[#allocation2 + $0x78] sm:$0xff]  ;;  %v157_v23 = vlaneseq }
  0x17   : > { %377 = vset.pattern.permute.xlu1 %v481_v0  ;;  %375 = vset.pattern.permute.xlu0 %v482_v1  ;;  %v194_v4 = vld [vmem:[#allocation2 + $0x70] sm:$0xff]  ;;  %v193_v5 = vld [vmem:[#allocation2 + $0x68] sm:$0xff]  ;;  %v192_v6 = vld [vmem:[#allocation2 + $0x60] sm:$0xff]  ;;  %v483_v8 = vmov 3   ;;  %v484_v9 = vmov 1   ;;  %v485_v27 = vmov 1.0  }
  0x18   : > { %s153_s28 = scalar_select %p152_p13, %s522_s13, 1  ;;  %196 = vmatpush.msra.mxu0 %v195_v3  ;;  %v191_v7 = vld [vmem:[#allocation2 + $0x58] sm:$0xff]  ;;  %v190_v10 = vld [vmem:[#allocation2 + $0x50] sm:$0xff]  ;;  %v189_v11 = vld [vmem:[#allocation2 + $0x48] sm:$0xff]  ;;  %v158_v24 = vand.u32 127, %v157_v23 }
  0x19   : > { %v188_v12 = vld [vmem:[#allocation2 + $0x40] sm:$0xff]  ;;  %v187_v13 = vld [vmem:[#allocation2 + $0x38] sm:$0xff]  ;;  %v186_v14 = vld [vmem:[#allocation2 + $0x30] sm:$0xff]  ;;  %s149_s5 = sand.u32 1, %s468_s10   ;;  %s315_s7 = sshll.u32 %s522_s13, 3 }
  0x1a   : > { %s311_s29 = sshll.u32 %s153_s28, 3  ;;  %197 = vmatpush.msra.mxu0 %v194_v4  ;;  %v185_v15 = vld [vmem:[#allocation2 + $0x28] sm:$0xff]  ;;  %v184_v16 = vld [vmem:[#allocation2 + $0x20] sm:$0xff]  ;;  %v183_v17 = vld [vmem:[#allocation2 + $0x18] sm:$0xff]  ;;  %s310_s6 = sshll.u32 %s149_s5, 3 }
  0x1b   : > { %s155_s4 = scalar_lea.vmem %s596_s0, %s311_s29  ;;  %v182_v18 = vld [vmem:[#allocation2 + $0x10] sm:$0xff]  ;;  %v181_v19 = vld [vmem:[#allocation2 + $0x8] sm:$0xff]  ;;  %v180_v20 = vld [vmem:[#allocation2] sm:$0xff]  ;;  %s228_s16 = scalar_lea.hbm %s598_s2, %s315_s7 }
  0x1c   : > { %v156_v2 = vld [vmem:[%s155_s4] sm:$0xff]  ;;  %198 = vmatpush.msra.mxu0 %v193_v5  ;;  %s151_s17 = scalar_lea.vmem [#allocation5], %s310_s6  ;;  %s232_s22 = sshll.u32 %s228_s16, 4  ;;  %s233_s22 = int_to_ptr.hbm [resolvable:$true] %s232_s22 }
  0x1d   : > { %168 = vperm.xlu1 %377, %v156_v2   ;;  %160 = vperm.xlu0 %375, %v156_v2   ;;  %s230_s21 = sshll.u32 %s151_s17, 4  ;;  %s218_s23 = scalar_lea.sflag [#allocation4], %s149_s5  ;;  %s231_s21 = int_to_ptr.vmem [resolvable:$true] %s230_s21 }
  0x1e   : > { %199 = vmatpush.msra.mxu0 %v192_v6  ;;  %s424_s24 = sshra.s32 %s233_s22, 4  ;;  %s430_s27 = scalar_lea.hbm %s598_s2, 16  ;;  %s425_s24 = int_to_ptr.hbm [resolvable:$true] %s424_s24 }
  0x1f   : > { %s426_s25 = scalar_lea.hbm %s425_s24, 8  ;;  %p431_p3 = scmp.lt.s32.totalorder %s425_s24, %s598_s2 }
  0x20   : > { %200 = vmatpush.msra.mxu0 %v191_v7  ;;  %p427_p0 = scmp.ne.s32.totalorder %s425_s24, %s426_s25  ;;  %p432_p4 = scmp.lt.s32.totalorder %s430_s27, %s426_s25 }
  0x22   : > { %201 = vmatpush.msra.mxu0 %v190_v10  ;;  %p428_p1 = pnand %p427_p0, %p539_p5  ;;  %p433_p7 = por %p432_p4, %p431_p3 }
  0x24   : > { %202 = vmatpush.msra.mxu0 %v189_v11  ;;  %p429_p2 = pneg %p428_p1 }
  0x25   : > { %378 = vset.pattern.permute.xlu1 %v483_v8  ;;  %376 = vset.pattern.permute.xlu0 %v484_v9 }
  0x26   : > { %172 = vperm.xlu1 %378, %v156_v2   ;;  %164 = vperm.xlu0 %376, %v156_v2   ;;  %p434_p8 = pnand %p433_p7, %p429_p2 }
  0x27   : > { %203 = vmatpush.msra.mxu0 %v188_v12 }
  0x29   : > { %204 = vmatpush.msra.mxu0 %v187_v13 }
  0x2b   : > { %205 = vmatpush.msra.mxu0 %v186_v14 }
  0x2d   : > { %206 = vmatpush.msra.mxu0 %v185_v15 }
  0x2e   : > { %379 = vset.pattern.permute.xlu0 %v483_v8 }
  0x2f   : > { %207 = vmatpush.msra.mxu0 %v184_v16 }
  0x31   : > { %208 = vmatpush.msra.mxu0 %v183_v17 }
  0x33   : > { %209 = vmatpush.msra.mxu0 %v182_v18 }
  0x35   : > { %210 = vmatpush.msra.mxu0 %v181_v19 }
  0x37   : > { %211 = vmatpush.msra.mxu0 %v180_v20 }
  0x8f   : > { %v169_v21 = vpop.permute.xlu1 %168  ;;  %v161_v22 = vpop.permute.xlu0 %160 }
  0x90   : > { %vm170_vm0 = vcmp.eq.s32.totalorder %v158_v24, %v169_v21  ;;  %vm162_vm3 = vcmp.eq.s32.totalorder %v158_v24, %v161_v22 }
  0x98   : > { %v173_v25 = vpop.permute.xlu1 %172  ;;  %v165_v26 = vpop.permute.xlu0 %164 }
  0x99   : > { %vm174_vm1 = vcmp.eq.s32.totalorder %v158_v24, %v173_v25  ;;  %vm166_vm2 = vcmp.eq.s32.totalorder %v158_v24, %v165_v26 }
  0x9a   : > { %vm176_vm4 = vmor %vm170_vm0, %vm174_vm1 }
  0x9b   : > { %vm175_vm5 = vmor %vm162_vm3, %vm166_vm2 }
  0x9c   : > { %vm177_vm6 = vmor %vm175_vm5, %vm176_vm4 }
  0x9d   : > { %313 = vmatmul.msk.f32.vlgmr.msra.gmra.mxu0 %vm177_vm6, %v485_v27 }
 0x11a   : > { %v213_v28 = vpop.f32.mrf.mxu0 }
 0x11b   : > { %216 = vst [vmem:[%s151_s17] sm:$0xff] %v213_v28 }
 0x11c   : > { %437 = shalt.err (!%p434_p8)
}
 0x11d   : > { %322 = dma.vmem_to_hbm [thread:$0]  (%p539_p5), %s231_s21, 128, %s233_s22, %s218_s23  }
 0x11e PF: > { %p334_p9 = scmp.ge.s32.totalorder %s476_s12, 2  ;;  %s244_s30 = sand.u32 1, %s464_s9  }
 0x11f   : > { %s245_s3 = scalar_lea.sflag [#allocation4], %s244_s30 }
 0x120   : > { %p329_p10 = pnand %p334_p9, %p543_p6 }
 0x122   : > { %p330_p11 = pneg %p329_p10 }
 0x124   : > { %459 = dma.done.wait (%p330_p11), %s245_s3, 128  }
 0x125   : > { %461 = vsyncadd (%p330_p11), %s245_s3, 4294967168  ;;  %p13_p12 = scmp.ge.s32.totalorder %s526_s15, 4   ;;  %s601_s9 = smov %s468_s10 }
 0x126   : > { %s602_s10 = smov %s472_s11  ;;  %s603_s11 = smov %s537_s18 }
 0x127   : > { %s604_s12 = smov %s526_s15  ;;  %15 = sbr.rel (!%p13_p12) target bundleno = 4 (0x4), region = 68 }
 0x12c   :  { %251 = vsyncpa [#allocation3], 1 }
 0x12d   :  { %253 = vsyncpa [#allocation3 + $0x1], 1 }
 0x12e   :  { %254 = vsyncpa [#allocation4], 1 }
 0x12f   :  { %256 = vsyncpa [#allocation4 + $0x1], 1 }

</bundles_post_ra>
